<compile_context>
chip_gen: v5e
topology: v5e:2x2
jax: 0.10.0
libtpu: 0.0.40
codegen_flags: <defaults>
</compile_context>

<pallas_src>
import functools
import math

import jax
import jax.numpy as jnp
from jax.experimental import pallas as pl
from jax.experimental.pallas import tpu as pltpu


def _attention_kernel(x_ref, wqkv_ref, bqkv_ref, wo_ref, bo_ref, *rest,
                      num_heads, head_dim, vis):
  """One grid step == one batch element.

  x_ref:     (1, S, H)       input hidden states (compute dtype, bf16)
  wqkv_ref:  (nh, H, 3*d)    per-head fused Q|K|V weights (Q pre-scaled by 1/sqrt(d))
  bqkv_ref:  (nh, 1, 3*d)    per-head fused Q|K|V bias, f32 (Q bias pre-scaled)
  wo_ref:    (H, H)          output projection weight
  bo_ref:    (1, H)          output projection bias, f32
  out_ref:   (1, S, H)       attention output
  probs_ref: (1, nh, S, S)   post-softmax attention probabilities (only if vis)
  ctx_ref:   (S, H) scratch  merged per-head context (compute dtype)
  """
  if vis:
    out_ref, probs_ref, ctx_ref = rest
  else:
    out_ref, ctx_ref = rest
    probs_ref = None

  d = head_dim
  nh = num_heads
  S = x_ref.shape[1]
  H = x_ref.shape[2]
  cdt = wqkv_ref.dtype            # MXU operand dtype (bf16)

  x = x_ref[0]                                             # (S, H)
  xb = jnp.broadcast_to(x, (nh, S, H))                     # (nh, S, H)

  # Fused, head-batched QKV projection; f32 accumulation on the MXU.
  qkv = jnp.einsum("hsk,hkd->hsd", xb, wqkv_ref[...],
                   preferred_element_type=jnp.float32)     # (nh, S, 3d)
  qkv = qkv + bqkv_ref[...]

  # 1/sqrt(d) is already folded into the Q weights/bias (trace time).
  q = qkv[..., :d].astype(cdt)                             # (nh, S, d)
  k = qkv[..., d:2 * d].astype(cdt)                        # (nh, S, d)
  v = qkv[..., 2 * d:].astype(cdt)                         # (nh, S, d)

  # Scores for all heads in one batched matmul; K contracted on its last dim
  # (operand mapping, no explicit transpose).
  scores = jnp.einsum("hqd,hkd->hqk", q, k,
                      preferred_element_type=jnp.float32)  # (nh, S, S)

  # Numerically-stable softmax over keys.
  m = jnp.max(scores, axis=-1, keepdims=True)
  e = jnp.exp(scores - m)
  denom = jnp.sum(e, axis=-1, keepdims=True)
  inv = pl.reciprocal(denom, approx=True)                  # EUP slot (~free)

  if vis:
    p = e * inv                                            # (nh, S, S)
    probs_ref[0] = p
    ctx = jnp.einsum("hqk,hkd->hqd", p.astype(cdt), v,
                     preferred_element_type=jnp.float32)   # (nh, S, d)
  else:
    # Defer normalization: divide the (S, d) context, not the (S, S) probs.
    ctx = jnp.einsum("hqk,hkd->hqd", e.astype(cdt), v,
                     preferred_element_type=jnp.float32)   # (nh, S, d)
    ctx = ctx * inv

  # Merge heads into a lane-contiguous (S, H) scratch slab (matches
  # permute(0,2,1,3).reshape(..., all_head_size)); bounds live ranges,
  # avoids concatenate.
  for h in range(nh):                                      # static, nh is small
    ctx_ref[:, h * d:(h + 1) * d] = ctx[h].astype(ctx_ref.dtype)

  # Single output projection over the full hidden dim.
  out = jnp.dot(ctx_ref[...], wo_ref[...],
                preferred_element_type=jnp.float32) + bo_ref[...]
  out_ref[0] = out.astype(out_ref.dtype)


def attention_forward(hidden_states, params, *, num_heads, vis=True,
                      compute_dtype=jnp.bfloat16):
  """Pallas multi-head self-attention (eval mode, self-attention path).

  hidden_states: (B, S, H)
  params: dict with wq,bq,wk,bk,wv,bv,wo,bo   (weights as (in, out))
  Returns (attention_output (B,S,H), weights (B,nh,S,S) if vis else None).
  """
  B, S, H = hidden_states.shape
  assert H % num_heads == 0
  d = H // num_heads
  scale = 1.0 / math.sqrt(d)
  f32 = jnp.float32

  def split_heads_w(w):                        # (H, H) -> (nh, H, d)
    return w.reshape(H, num_heads, d).transpose(1, 0, 2)

  # Fold the softmax scale into the query projection at trace time.
  wq = params["wq"].astype(f32) * scale
  bq = params["bq"].astype(f32) * scale

  wqkv = jnp.concatenate(
      [split_heads_w(wq),
       split_heads_w(params["wk"].astype(f32)),
       split_heads_w(params["wv"].astype(f32))],
      axis=-1).astype(compute_dtype)                               # (nh, H, 3d)
  bqkv = jnp.concatenate(
      [bq.reshape(num_heads, d),
       params["bk"].astype(f32).reshape(num_heads, d),
       params["bv"].astype(f32).reshape(num_heads, d)],
      axis=-1).reshape(num_heads, 1, 3 * d).astype(f32)            # (nh, 1, 3d)

  wo = params["wo"].astype(compute_dtype)                          # (H, H)
  bo = params["bo"].astype(f32).reshape(1, H)                      # (1, H)

  x = hidden_states.astype(compute_dtype)

  kernel = functools.partial(_attention_kernel,
                             num_heads=num_heads, head_dim=d, vis=vis)

  def rep(shape):
    return pl.BlockSpec(shape, lambda b: (0,) * len(shape))

  in_specs = [
      pl.BlockSpec((1, S, H), lambda b: (b, 0, 0)),                # x
      rep((num_heads, H, 3 * d)),                                  # wqkv
      rep((num_heads, 1, 3 * d)),                                  # bqkv
      rep((H, H)),                                                 # wo
      rep((1, H)),                                                 # bo
  ]

  out_dtype = hidden_states.dtype
  if vis:
    out_shape = (jax.ShapeDtypeStruct((B, S, H), out_dtype),
                 jax.ShapeDtypeStruct((B, num_heads, S, S), jnp.float32))
    out_specs = [pl.BlockSpec((1, S, H), lambda b: (b, 0, 0)),
                 pl.BlockSpec((1, num_heads, S, S), lambda b: (b, 0, 0, 0))]
  else:
    out_shape = jax.ShapeDtypeStruct((B, S, H), out_dtype)
    out_specs = pl.BlockSpec((1, S, H), lambda b: (b, 0, 0))

  result = pl.pallas_call(
      kernel,
      out_shape=out_shape,
      grid_spec=pltpu.PrefetchScalarGridSpec(
          num_scalar_prefetch=0,
          grid=(B,),
          in_specs=in_specs,
          out_specs=out_specs,
          scratch_shapes=[pltpu.VMEM((S, H), compute_dtype)],
      ),
      compiler_params=pltpu.CompilerParams(
          dimension_semantics=("parallel",),        # batch shards across TCs
          vmem_limit_bytes=32 * 1024 * 1024),
  )(x, wqkv, bqkv, wo, bo)

  if vis:
    out, probs = result
    return out, probs
  return result, None


def _reference(hidden_states, params, num_heads):
  """Pure-JAX reference mirroring the PyTorch forward (eval mode, f32)."""
  B, S, H = hidden_states.shape
  d = H // num_heads
  lin = lambda x, w, b: x @ w + b
  q = lin(hidden_states, params["wq"], params["bq"])
  k = lin(hidden_states, params["wk"], params["bk"])
  v = lin(hidden_states, params["wv"], params["bv"])
  split = lambda t: t.reshape(B, S, num_heads, d).transpose(0, 2, 1, 3)
  qh, kh, vh = split(q), split(k), split(v)
  scores = jnp.einsum("bhqd,bhkd->bhqk", qh, kh) / math.sqrt(d)
  probs = jax.nn.softmax(scores, axis=-1)
  ctx = jnp.einsum("bhqk,bhkd->bhqd", probs, vh)
  ctx = ctx.transpose(0, 2, 1, 3).reshape(B, S, H)
  out = lin(ctx, params["wo"], params["bo"])
  return out, probs


if __name__ == "__main__":
  # config: hidden_size=32, num_heads=4 -> head_dim=8 ; batch=2, seq=8
  B, S, H, NH = 2, 8, 32, 4

  key = jax.random.PRNGKey(0)
  keys = jax.random.split(key, 10)
  init = lambda k, shape: (jax.random.normal(k, shape, jnp.float32) * 0.05)

  params = {
      "wq": init(keys[0], (H, H)), "bq": init(keys[1], (H,)),
      "wk": init(keys[2], (H, H)), "bk": init(keys[3], (H,)),
      "wv": init(keys[4], (H, H)), "bv": init(keys[5], (H,)),
      "wo": init(keys[6], (H, H)), "bo": init(keys[7], (H,)),
  }
  x = jax.random.normal(keys[8], (B, S, H), jnp.float32)

  # vis=True variant (returns attention probs)
  out, weights = attention_forward(x, params, num_heads=NH, vis=True)
  out = jax.block_until_ready(out)
  weights = jax.block_until_ready(weights)
  assert weights is not None

  # vis=False variant (no probs output compiled at all)
  out_novis, w_none = attention_forward(x, params, num_heads=NH, vis=False)
  out_novis = jax.block_until_ready(out_novis)
  assert w_none is None

  ref_out, ref_w = _reference(x, params, NH)
  # bf16 MXU operands with f32 accumulation -> relaxed tolerances vs f32 ref.
  assert jnp.allclose(out, ref_out, atol=2e-2, rtol=2e-2), "output mismatch"
  assert jnp.allclose(weights, ref_w, atol=2e-2, rtol=2e-2), "weights mismatch"
  assert jnp.allclose(out_novis, ref_out, atol=2e-2, rtol=2e-2), "vis=False output mismatch"

  print("KERNEL_OK")
</pallas_src>

<mosaic_0001>
module attributes {stable_mosaic.version = 11 : i64} {
  func.func @_attention_kernel(%arg0: i32, %arg1: memref<1x8x32xbf16, #tpu.memory_space<vmem>>, %arg2: memref<4x32x24xbf16, #tpu.memory_space<vmem>>, %arg3: memref<4x1x24xf32, #tpu.memory_space<vmem>>, %arg4: memref<32x32xbf16, #tpu.memory_space<vmem>>, %arg5: memref<1x32xf32, #tpu.memory_space<vmem>>, %arg6: memref<1x8x32xf32, #tpu.memory_space<vmem>>, %arg7: memref<1x4x8x8xf32, #tpu.memory_space<vmem>>, %arg8: memref<8x32xbf16, #tpu.memory_space<vmem>>) attributes {dimension_semantics = [#tpu.dimension_semantics<parallel>], iteration_bounds = array<i64: 2>, scalar_prefetch = 0 : i64, scratch_operands = 1 : i64, tpu.core_type = #tpu.core_type<tc>, window_params = [{transform_indices = @transform_0, window_bounds = array<i64: 1, 8, 32>}, {pipeline_mode = #tpu.pipeline_mode<synchronous>, transform_indices = @transform_1, window_bounds = array<i64: 4, 32, 24>}, {pipeline_mode = #tpu.pipeline_mode<synchronous>, transform_indices = @transform_2, window_bounds = array<i64: 4, 1, 24>}, {pipeline_mode = #tpu.pipeline_mode<synchronous>, transform_indices = @transform_3, window_bounds = array<i64: 32, 32>}, {pipeline_mode = #tpu.pipeline_mode<synchronous>, transform_indices = @transform_4, window_bounds = array<i64: 1, 32>}, {transform_indices = @transform_5, window_bounds = array<i64: 1, 8, 32>}, {transform_indices = @transform_6, window_bounds = array<i64: 1, 4, 8, 8>}]} {
    %c0 = arith.constant 0 : index
    %c0_0 = arith.constant 0 : index
    %c0_1 = arith.constant 0 : index
    %0 = vector.load %arg1[%c0, %c0_0, %c0_1] : memref<1x8x32xbf16, #tpu.memory_space<vmem>>, vector<1x8x32xbf16>
    %1 = vector.shape_cast %0 : vector<1x8x32xbf16> to vector<8x32xbf16>
    %2 = vector.shape_cast %1 : vector<8x32xbf16> to vector<1x8x32xbf16>
    %3 = vector.broadcast %2 : vector<1x8x32xbf16> to vector<4x8x32xbf16>
    %c0_2 = arith.constant 0 : index
    %c0_3 = arith.constant 0 : index
    %c0_4 = arith.constant 0 : index
    %4 = vector.load %arg2[%c0_2, %c0_3, %c0_4] : memref<4x32x24xbf16, #tpu.memory_space<vmem>>, vector<4x32x24xbf16>
    "tpu.trace_start"() <{level = 10 : i32, message = "hsk,hkd->hsd"}> : () -> ()
    %cst = arith.constant dense<0.000000e+00> : vector<4x8x24xf32>
    %5 = tpu.matmul %3, %4, %cst {dimension_numbers = #tpu.dot_dimension_numbers<[2], [1], [1], [2], [0, 0, 0, 1, 1, 2], [0], [0]>} : vector<4x8x32xbf16>, vector<4x32x24xbf16>, vector<4x8x24xf32> -> vector<4x8x24xf32>
    "tpu.trace_stop"() : () -> ()
    %c0_5 = arith.constant 0 : index
    %c0_6 = arith.constant 0 : index
    %c0_7 = arith.constant 0 : index
    %6 = vector.load %arg3[%c0_5, %c0_6, %c0_7] : memref<4x1x24xf32, #tpu.memory_space<vmem>>, vector<4x1x24xf32>
    %7 = vector.broadcast %6 : vector<4x1x24xf32> to vector<4x8x24xf32>
    %8 = arith.addf %5, %7 : vector<4x8x24xf32>
    %9 = vector.extract_strided_slice %8 {offsets = [0, 0, 0], sizes = [4, 8, 8], strides = [1, 1, 1]} : vector<4x8x24xf32> to vector<4x8x8xf32>
    %10 = arith.truncf %9 : vector<4x8x8xf32> to vector<4x8x8xbf16>
    %11 = vector.extract_strided_slice %8 {offsets = [0, 0, 8], sizes = [4, 8, 8], strides = [1, 1, 1]} : vector<4x8x24xf32> to vector<4x8x8xf32>
    %12 = arith.truncf %11 : vector<4x8x8xf32> to vector<4x8x8xbf16>
    %13 = vector.extract_strided_slice %8 {offsets = [0, 0, 16], sizes = [4, 8, 8], strides = [1, 1, 1]} : vector<4x8x24xf32> to vector<4x8x8xf32>
    %14 = arith.truncf %13 : vector<4x8x8xf32> to vector<4x8x8xbf16>
    "tpu.trace_start"() <{level = 10 : i32, message = "hqd,hkd->hqk"}> : () -> ()
    %cst_8 = arith.constant dense<0.000000e+00> : vector<4x8x8xf32>
    %15 = tpu.matmul %10, %12, %cst_8 {dimension_numbers = #tpu.dot_dimension_numbers<[2], [2], [1], [1], [0, 0, 0, 1, 1, 1], [0], [0]>} : vector<4x8x8xbf16>, vector<4x8x8xbf16>, vector<4x8x8xf32> -> vector<4x8x8xf32>
    "tpu.trace_stop"() : () -> ()
    %cst_9 = arith.constant dense<0xFF800000> : vector<4x8xf32>
    %16 = vector.multi_reduction <maximumf>, %15, %cst_9 [2] : vector<4x8x8xf32> to vector<4x8xf32>
    %17 = vector.shape_cast %16 : vector<4x8xf32> to vector<4x8x1xf32>
    %18 = vector.broadcast %17 : vector<4x8x1xf32> to vector<4x8x8xf32>
    %19 = arith.subf %15, %18 : vector<4x8x8xf32>
    %20 = math.exp %19 : vector<4x8x8xf32>
    %cst_10 = arith.constant dense<0.000000e+00> : vector<4x8xf32>
    %21 = vector.multi_reduction <add>, %20, %cst_10 [2] : vector<4x8x8xf32> to vector<4x8xf32>
    %22 = vector.shape_cast %21 : vector<4x8xf32> to vector<4x8x1xf32>
    %23 = tpu.reciprocal %22 {approx = true} : vector<4x8x1xf32> -> vector<4x8x1xf32>
    %24 = vector.broadcast %23 : vector<4x8x1xf32> to vector<4x8x8xf32>
    %25 = arith.mulf %20, %24 : vector<4x8x8xf32>
    %c0_11 = arith.constant 0 : index
    %c0_12 = arith.constant 0 : index
    %c0_13 = arith.constant 0 : index
    %c0_14 = arith.constant 0 : index
    %26 = vector.load %arg7[%c0_11, %c0_12, %c0_13, %c0_14] : memref<1x4x8x8xf32, #tpu.memory_space<vmem>>, vector<1x4x8x8xf32>
    %27 = vector.shape_cast %26 : vector<1x4x8x8xf32> to vector<4x8x8xf32>
    %28 = vector.shape_cast %25 : vector<4x8x8xf32> to vector<1x4x8x8xf32>
    tpu.vector_store %arg7[%c0_11, %c0_12, %c0_13, %c0_14], %28 {strides = array<i32>} : memref<1x4x8x8xf32, #tpu.memory_space<vmem>>, vector<1x4x8x8xf32>,
    %29 = arith.truncf %25 : vector<4x8x8xf32> to vector<4x8x8xbf16>
    "tpu.trace_start"() <{level = 10 : i32, message = "hqk,hkd->hqd"}> : () -> ()
    %cst_15 = arith.constant dense<0.000000e+00> : vector<4x8x8xf32>
    %30 = tpu.matmul %29, %14, %cst_15 {dimension_numbers = #tpu.dot_dimension_numbers<[2], [1], [1], [2], [0, 0, 0, 1, 1, 2], [0], [0]>} : vector<4x8x8xbf16>, vector<4x8x8xbf16>, vector<4x8x8xf32> -> vector<4x8x8xf32>
    "tpu.trace_stop"() : () -> ()
    %31 = vector.extract_strided_slice %30 {offsets = [0, 0, 0], sizes = [1, 8, 8], strides = [1, 1, 1]} : vector<4x8x8xf32> to vector<1x8x8xf32>
    %32 = vector.shape_cast %31 : vector<1x8x8xf32> to vector<8x8xf32>
    %33 = arith.truncf %32 : vector<8x8xf32> to vector<8x8xbf16>
    %c0_16 = arith.constant 0 : index
    %c0_17 = arith.constant 0 : index
    %34 = vector.load %arg8[%c0_16, %c0_17] : memref<8x32xbf16, #tpu.memory_space<vmem>>, vector<8x8xbf16>
    tpu.vector_store %arg8[%c0_16, %c0_17], %33 {strides = array<i32>} : memref<8x32xbf16, #tpu.memory_space<vmem>>, vector<8x8xbf16>,
    %35 = vector.extract_strided_slice %30 {offsets = [1, 0, 0], sizes = [1, 8, 8], strides = [1, 1, 1]} : vector<4x8x8xf32> to vector<1x8x8xf32>
    %36 = vector.shape_cast %35 : vector<1x8x8xf32> to vector<8x8xf32>
    %37 = arith.truncf %36 : vector<8x8xf32> to vector<8x8xbf16>
    %c0_18 = arith.constant 0 : index
    %c8 = arith.constant 8 : index
    %38 = vector.load %arg8[%c0_18, %c8] : memref<8x32xbf16, #tpu.memory_space<vmem>>, vector<8x8xbf16>
    tpu.vector_store %arg8[%c0_18, %c8], %37 {strides = array<i32>} : memref<8x32xbf16, #tpu.memory_space<vmem>>, vector<8x8xbf16>,
    %39 = vector.extract_strided_slice %30 {offsets = [2, 0, 0], sizes = [1, 8, 8], strides = [1, 1, 1]} : vector<4x8x8xf32> to vector<1x8x8xf32>
    %40 = vector.shape_cast %39 : vector<1x8x8xf32> to vector<8x8xf32>
    %41 = arith.truncf %40 : vector<8x8xf32> to vector<8x8xbf16>
    %c0_19 = arith.constant 0 : index
    %c16 = arith.constant 16 : index
    %42 = vector.load %arg8[%c0_19, %c16] : memref<8x32xbf16, #tpu.memory_space<vmem>>, vector<8x8xbf16>
    tpu.vector_store %arg8[%c0_19, %c16], %41 {strides = array<i32>} : memref<8x32xbf16, #tpu.memory_space<vmem>>, vector<8x8xbf16>,
    %43 = vector.extract_strided_slice %30 {offsets = [3, 0, 0], sizes = [1, 8, 8], strides = [1, 1, 1]} : vector<4x8x8xf32> to vector<1x8x8xf32>
    %44 = vector.shape_cast %43 : vector<1x8x8xf32> to vector<8x8xf32>
    %45 = arith.truncf %44 : vector<8x8xf32> to vector<8x8xbf16>
    %c0_20 = arith.constant 0 : index
    %c24 = arith.constant 24 : index
    %46 = vector.load %arg8[%c0_20, %c24] : memref<8x32xbf16, #tpu.memory_space<vmem>>, vector<8x8xbf16>
    tpu.vector_store %arg8[%c0_20, %c24], %45 {strides = array<i32>} : memref<8x32xbf16, #tpu.memory_space<vmem>>, vector<8x8xbf16>,
    %c0_21 = arith.constant 0 : index
    %c0_22 = arith.constant 0 : index
    %47 = vector.load %arg8[%c0_21, %c0_22] : memref<8x32xbf16, #tpu.memory_space<vmem>>, vector<8x32xbf16>
    %c0_23 = arith.constant 0 : index
    %c0_24 = arith.constant 0 : index
    %48 = vector.load %arg4[%c0_23, %c0_24] : memref<32x32xbf16, #tpu.memory_space<vmem>>, vector<32x32xbf16>
    %cst_25 = arith.constant dense<0.000000e+00> : vector<8x32xf32>
    %49 = tpu.matmul %47, %48, %cst_25 {dimension_numbers = #tpu.dot_dimension_numbers<[1], [0], [0], [1], [0, 0, 1, 1], [], []>} : vector<8x32xbf16>, vector<32x32xbf16>, vector<8x32xf32> -> vector<8x32xf32>
    %c0_26 = arith.constant 0 : index
    %c0_27 = arith.constant 0 : index
    %50 = vector.load %arg5[%c0_26, %c0_27] : memref<1x32xf32, #tpu.memory_space<vmem>>, vector<1x32xf32>
    %51 = vector.broadcast %50 : vector<1x32xf32> to vector<8x32xf32>
    %52 = arith.addf %49, %51 : vector<8x32xf32>
    %c0_28 = arith.constant 0 : index
    %c0_29 = arith.constant 0 : index
    %c0_30 = arith.constant 0 : index
    %53 = vector.load %arg6[%c0_28, %c0_29, %c0_30] : memref<1x8x32xf32, #tpu.memory_space<vmem>>, vector<1x8x32xf32>
    %54 = vector.shape_cast %53 : vector<1x8x32xf32> to vector<8x32xf32>
    %55 = vector.shape_cast %52 : vector<8x32xf32> to vector<1x8x32xf32>
    tpu.vector_store %arg6[%c0_28, %c0_29, %c0_30], %55 {strides = array<i32>} : memref<1x8x32xf32, #tpu.memory_space<vmem>>, vector<1x8x32xf32>,
    return
  }
  func.func @transform_0(%arg0: i32) -> (i32, i32, i32) {
    %c0_i32 = arith.constant 0 : i32
    %c0_i32_0 = arith.constant 0 : i32
    %c0_i32_1 = arith.constant 0 : i32
    return %arg0, %c0_i32, %c0_i32_0 : i32, i32, i32
  }
  func.func @transform_1(%arg0: i32) -> (i32, i32, i32) {
    %c0_i32 = arith.constant 0 : i32
    %c0_i32_0 = arith.constant 0 : i32
    %c0_i32_1 = arith.constant 0 : i32
    %c0_i32_2 = arith.constant 0 : i32
    return %c0_i32, %c0_i32_0, %c0_i32_1 : i32, i32, i32
  }
  func.func @transform_2(%arg0: i32) -> (i32, i32, i32) {
    %c0_i32 = arith.constant 0 : i32
    %c0_i32_0 = arith.constant 0 : i32
    %c0_i32_1 = arith.constant 0 : i32
    %c0_i32_2 = arith.constant 0 : i32
    return %c0_i32, %c0_i32_0, %c0_i32_1 : i32, i32, i32
  }
  func.func @transform_3(%arg0: i32) -> (i32, i32) {
    %c0_i32 = arith.constant 0 : i32
    %c0_i32_0 = arith.constant 0 : i32
    %c0_i32_1 = arith.constant 0 : i32
    return %c0_i32, %c0_i32_0 : i32, i32
  }
  func.func @transform_4(%arg0: i32) -> (i32, i32) {
    %c0_i32 = arith.constant 0 : i32
    %c0_i32_0 = arith.constant 0 : i32
    %c0_i32_1 = arith.constant 0 : i32
    return %c0_i32, %c0_i32_0 : i32, i32
  }
  func.func @transform_5(%arg0: i32) -> (i32, i32, i32) {
    %c0_i32 = arith.constant 0 : i32
    %c0_i32_0 = arith.constant 0 : i32
    %c0_i32_1 = arith.constant 0 : i32
    return %arg0, %c0_i32, %c0_i32_0 : i32, i32, i32
  }
  func.func @transform_6(%arg0: i32) -> (i32, i32, i32, i32) {
    %c0_i32 = arith.constant 0 : i32
    %c0_i32_0 = arith.constant 0 : i32
    %c0_i32_1 = arith.constant 0 : i32
    %c0_i32_2 = arith.constant 0 : i32
    return %arg0, %c0_i32, %c0_i32_0, %c0_i32_1 : i32, i32, i32, i32
  }
}

</mosaic_0001>

<bundles_post_ra>
// kernel: tpu_custom_call.1
= control target key start
LH: loop header
LB: loop body
LE: loop exit
PB: predicated region body
PF: predicated region fallthrough
CT: control target
= control target key end

     0   :  { %s1313_s0 = inlined_call_operand.vmem [shape: bf16[2,8,32], index: 0, kind: input, shape index: {}]   ;;  %s1314_s1 = inlined_call_operand.vmem [shape: bf16[4,32,24], index: 1, kind: input, shape index: {}]   ;;  %s1315_s2 = inlined_call_operand.vmem [shape: f32[4,1,24], index: 2, kind: input, shape index: {}]   ;;  %s1316_s3 = inlined_call_operand.vmem [shape: bf16[32,32], index: 3, kind: input, shape index: {}]   ;;  %s1317_s4 = inlined_call_operand.vmem [shape: f32[1,32], index: 4, kind: input, shape index: {}]   ;;  %s1318_s5 = inlined_call_operand.hbm [shape: f32[2,8,32], index: 5, kind: output, shape index: {0}]   ;;  %s1319_s6 = inlined_call_operand.hbm [shape: f32[2,4,8,8], index: 6, kind: output, shape index: {1}]  }
   0x1   :  { %1321 = sst [smem:[#allocation9_spill]] %s1313_s0 }
   0x2   :  { %12 = vsyncpa [#allocation4], 0 }
   0x3   :  { %14 = vsyncpa [#allocation4 + $0x1], 0 }
   0x4   :  { %15 = vsyncpa [#allocation6], 0 }
   0x5   :  { %17 = vsyncpa [#allocation6 + $0x1], 0  ;;  %s1112_s21 = smov 0   ;;  %s1114_s22 = smov 0  }
   0x6   :  { %s1116_s23 = smov 0   ;;  %s1118_s24 = smov 0  }
   0x7 LB: > { %s1133_s25 = sadd.s32 4294967295, %s1069_s24   ;;  %s826_s26 = sadd.s32 4294967294, %s1069_s24   ;;  %s1069_s24 = sphi %s1118_s24, %s1329_s24   ;;  %s1065_s23 = sphi %s1116_s23, %s1328_s23   ;;  %s1061_s22 = sphi %s1114_s22, %s1327_s22   ;;  %s1057_s21 = sphi %s1112_s21, %s1326_s21  }
   0x8   : > { %s1137_s27 = sadd.s32 1, %s1069_s24   ;;  %s140_s28 = sadd.s32 1, %s1065_s23 }
   0x9   : > { %s137_s29 = ssub.s32 %s1069_s24, %s1137_s27  ;;  %p150_p0 = scmp.ne.s32.totalorder %s1065_s23, %s1061_s22 }
   0xa   : > { %p138_p1 = scmp.eq.s32.totalorder %s137_s29, 0  ;;  %p151_p2 = scmp.eq.s32.totalorder %s1133_s25, 1 }
   0xb   : > { %p156_p3 = scmp.ne.s32.totalorder %s1061_s22, %s1057_s21  ;;  %p157_p4 = scmp.eq.s32.totalorder %s826_s26, 1 }
   0xc   : > { %s1148_s30 = scalar_select %p138_p1, %s1065_s23, %s140_s28  }
   0xd   : > { %p1150_p5 = por %p151_p2, %p150_p0  ;;  %p1154_p6 = por %p157_p4, %p156_p3 }
   0xe   : > { %p829_p7 = scmp.ge.s32.totalorder %s1069_s24, 1  ;;  %p220_p8 = scmp.lt.s32.totalorder %s1069_s24, 3 }
  0x10   : > { %p221_p9 = pnand %p829_p7, %p220_p8 }
  0x11   : > { %p254_p10 = scmp.lt.s32.totalorder (!%p221_p9), %s1133_s25, 1  ;;  %s1324_s0 = sld [smem:[#allocation9_spill]] (!%p221_p9) }
  0x12   : > { %224 = sbr.rel (%p221_p9) target bundleno = 1083 (0x43b), region = 40  ;;  %s1071_s29 = smov (!%p221_p9), 120  }
  0x13   : > { %s1233_s10 = sand.u32 (!%p221_p9), 1, %s1061_s22   ;;  %s1320_s13 = smov (!%p221_p9), 8  }
  0x14   : > { %s831_s11 = sshll.u32 (!%p221_p9), %s1233_s10, 5  ;;  %s1075_s15 = smov (!%p221_p9), 16  }
  0x15   : > { %s1236_s12 = scalar_lea.vmem (!%p221_p9), [#allocation5], %s831_s11  ;;  %s903_s20 = sshll.u32 (!%p221_p9), %s1133_s25, 5 }
  0x17   : > { %v896_v0 = vld [vmem:[%s1314_s1 + $0x18] sm:$0xff]  ;;  %v898_v1 = vld [vmem:[%s1314_s1 + $0x28] sm:$0xff]  ;;  %v895_v3 = vld [vmem:[%s1314_s1 + $0x10] sm:$0xff]  ;;  %s255_s19 = scalar_select %p254_p10, %s1133_s25, 1  ;;  %vm304_vm0 = vcmask 261120   ;;  %vm405_vm1 = vcmask 64512  }
  0x18   : > { %v900_v2 = vld [vmem:[%s1314_s1 + $0x38] sm:$0xff]  ;;  %339 = vmatpush.bf16.msra.mxu1 %v896_v0  ;;  %364 = vmatpush.bf16.msra.mxu2 %v898_v1  ;;  %v897_v4 = vld [vmem:[%s1314_s1 + $0x20] sm:$0xff]  ;;  %v894_v5 = vld [vmem:[%s1314_s1 + $0x8] sm:$0xff]  ;;  %vm554_vm2 = vcmask 1043456   ;;  %vm635_vm3 = vcmask 60416   ;;  %vm642_vm4 = vcmask 126016  }
  0x19   : > { %389 = vmatpush.bf16.msra.mxu3 %v900_v2  ;;  %v899_v6 = vld [vmem:[%s1314_s1 + $0x30] sm:$0xff]  ;;  %s832_s9 = sshll.u32 %s255_s19, 2  ;;  %314 = vmatpush.bf16.msra.mxu0 %v894_v5  ;;  %v893_v7 = vld [vmem:[%s1314_s1] sm:$0xff]  ;;  %vm649_vm5 = vcmask 191616   ;;  %vm656_vm6 = vcmask 257216   ;;  %s995_s19 = scalar_lea.hbm %s1319_s6, 64 }
  0x1a   : > { %s257_s14 = scalar_lea.vmem %s1324_s0, %s832_s9  ;;  %v954_v9 = vld [vmem:[%s1315_s2 + $0x1] ss:$0 sm:$0xff]  ;;  %v957_v10 = vld [vmem:[%s1315_s2] ss:$0 sm:$0xff]  ;;  %v955_v15 = vld [vmem:[%s1315_s2 + $0x2] ss:$0 sm:$0xff] }
  0x1b   : > { %v259_v8 = vld [vmem:[%s257_s14] sm:$0xf]  ;;  %s1072_s9 = smov 112   ;;  %s1074_s14 = smov 24  }
  0x1c   : > { %340 = vmatpush.bf16.msra.mxu1 %v895_v3  ;;  %365 = vmatpush.bf16.msra.mxu2 %v897_v4  ;;  %v956_v17 = vld [vmem:[%s1315_s2 + $0x3] ss:$0 sm:$0xff] }
  0x1d   : > { %390 = vmatpush.bf16.msra.mxu3 %v899_v6  ;;  %315 = vmatpush.bf16.msra.mxu0 %v893_v7 }
  0x1f   : > { %850 = vmatmul.msk.bf16.vlgmr.msra.gmra.mxu1 %vm304_vm0, %v259_v8  ;;  %859 = vmatmul.msk.bf16.vlgmr.msra.gmra.mxu2 %vm304_vm0, %v259_v8 }
  0x20   : > { %868 = vmatmul.msk.bf16.vlgmr.msra.gmra.mxu3 %vm304_vm0, %v259_v8  ;;  %841 = vmatmul.msk.bf16.vlgmr.msra.gmra.mxu0 %vm304_vm0, %v259_v8 }
  0x9c   : > { %v342_v11 = vpop.f32.mrf.mxu1 }
  0x9d   : > { %v343_v12 = vadd.f32 %v954_v9, %v342_v11  ;;  %v317_v13 = vpop.f32.mrf.mxu0 }
  0x9e   : > { %v318_v16 = vadd.f32 %v957_v10, %v317_v13 }
  0x9f   : > { %v397_v14 = vpack.c.bf16 %v343_v12, %v343_v12 }
  0xa0   : > { %v396_v18 = vpack.c.bf16 %v318_v16, %v318_v16 }
  0xa1   : > { %v426_v19 = vunpack.c.l.b16 %v397_v14 }
  0xa2   : > { %v367_v20 = vpop.f32.mrf.mxu2  ;;  %v401_v27 = vunpack.c.l.b16 %v396_v18 }
  0xa3   : > { %v368_v21 = vadd.f32 %v955_v15, %v367_v20  ;;  %v392_v22 = vpop.f32.mrf.mxu3  ;;  %v427_v23 = vpack.c.b16 %v426_v19, %v426_v19 }
  0xa4   : > { %v393_v24 = vadd.f32 %v956_v17, %v392_v22  ;;  %v344_v25 = vpop.f32.mrf.mxu1  ;;  %v402_v31 = vpack.c.b16 %v401_v27, %v401_v27 }
  0xa5   : > { %v398_v26 = vpack.c.bf16 %v368_v21, %v368_v21  ;;  %428 = vrot.lane.b32.xlu1 %v427_v23, %s1071_s29  ;;  %v319_v28 = vpop.f32.mrf.mxu0 }
  0xa6   : > { %v399_v29 = vpack.c.bf16 %v393_v24, %v393_v24 }
  0xa7   : > { %v450_v30 = vunpack.c.l.b16 %v398_v26 }
  0xa8   : > { %v474_v34 = vunpack.c.l.b16 %v399_v29 }
  0xa9   : > { %v1205_v32 = vpack.c.b16 %v450_v30, %v450_v30 }
  0xaa   : > { %v369_v33 = vpop.f32.mrf.mxu2  ;;  %v475_v36 = vpack.c.b16 %v474_v34, %v474_v34 }
  0xab   : > { %v394_v35 = vpop.f32.mrf.mxu3  ;;  %452 = vrot.lane.b32.xlu0 %v1205_v32, %s1071_s29 }
  0xad   : > { %403 = vrot.lane.b32.xlu1 %v402_v31, %s1071_s29 }
  0xb3   : > { %476 = vrot.lane.b32.xlu0 %v475_v36, %s1071_s29  ;;  %s727_s29 = scalar_lea.hbm %s1319_s6, %s903_s20 }
  0xb4   : > { %s730_s11 = sshll.u32 %s727_s29, 4  ;;  %s731_s11 = int_to_ptr.hbm [resolvable:$true] %s730_s11 }
 0x117   : > { %v429_v37 = vpop.permute.xlu1 %428 }
 0x118   : > { %v434_v38 = vsel %vm405_vm1, %v429_v37, 0 }
 0x119   : > { %443 = vmatpush.bf16.xpose.msrb.mxu1 %v434_v38 }
 0x11d   : > { %v453_v39 = vpop.permute.xlu0 %452 }
 0x11e   : > { %v458_v40 = vsel %vm405_vm1, %v453_v39, 0 }
 0x11f   : > { %467 = vmatpush.bf16.xpose.msrb.mxu2 %v458_v40  ;;  %v404_v41 = vpop.permute.xlu1 %403 }
 0x120   : > { %870 = vmatmul.msk.bf16.vlgmr.msrb.gmra.mxu1 %vm405_vm1, %v397_v14  ;;  %v410_v42 = vsel %vm405_vm1, %v404_v41, 0 }
 0x121   : > { %419 = vmatpush.bf16.xpose.msrb.mxu0 %v410_v42 }
 0x125   : > { %v477_v43 = vpop.permute.xlu0 %476 }
 0x126   : > { %871 = vmatmul.msk.bf16.vlgmr.msrb.gmra.mxu2 %vm405_vm1, %v398_v26  ;;  %v482_v44 = vsel %vm405_vm1, %v477_v43, 0 }
 0x127   : > { %491 = vmatpush.bf16.xpose.msrb.mxu3 %v482_v44 }
 0x128   : > { %869 = vmatmul.msk.bf16.vlgmr.msrb.gmra.mxu0 %vm405_vm1, %v396_v18 }
 0x12e   : > { %872 = vmatmul.msk.bf16.vlgmr.msrb.gmra.mxu3 %vm405_vm1, %v399_v29 }
 0x19d   : > { %v445_v45 = vpop.f32.mrf.mxu1 }
 0x19e   : > { %v500_v46 = vsel %vm405_vm1, %v445_v45, -inf }
 0x19f   : > { %501 = vmax.xlane.f32.xlu0 %v500_v46 }
 0x1a5   : > { %v421_v47 = vpop.f32.mrf.mxu0  ;;  %v447_v48 = vpop.f32.mrf.mxu1 }
 0x1a6   : > { %v497_v49 = vsel %vm405_vm1, %v421_v47, -inf }
 0x1a7   : > { %498 = vmax.xlane.f32.xlu1 %v497_v49  ;;  %v902_v49 = vld [vmem:[%s1316_s3 + $0x8] sm:$0xff] }
 0x1a9   : > { %v469_v50 = vpop.f32.mrf.mxu2 }
 0x1aa   : > { %v503_v51 = vsel %vm405_vm1, %v469_v50, -inf }
 0x1ab   : > { %504 = vmax.xlane.f32.xlu2 %v503_v51 }
 0x1ad   : > { %v423_v52 = vpop.f32.mrf.mxu0 }
 0x1b1   : > { %v471_v53 = vpop.f32.mrf.mxu2  ;;  %v493_v54 = vpop.f32.mrf.mxu3 }
 0x1b2   : > { %v506_v55 = vsel %vm405_vm1, %v493_v54, -inf }
 0x1b3   : > { %507 = vmax.xlane.f32.xlu2 %v506_v55  ;;  %613 = vrot.lane.b32.xlu0 %v475_v36, %s1072_s9 }
 0x1b9   : > { %v495_v56 = vpop.f32.mrf.mxu3 }
 0x1bb   : > { %549 = vrot.lane.b32.xlu0 %v402_v31, %s1072_s9 }
 0x1c0   : > { %571 = vrot.lane.b32.xlu1 %v427_v23, %s1072_s9 }
 0x212   : > { %v502_v57 = vpop.xlane.xlu0 %501 }
 0x213   : > { %v510_v58 = vsub.f32 %v445_v45, %v502_v57 }
 0x215   : > { %v515_v59 = vmul.f32 1.442695, %v510_v58 }
 0x217   : > { %959 = vpow2.f32 %v515_v59 }
 0x21a   : > { %v499_v7 = vpop.xlane.xlu1 %498 }
 0x21b   : > { %v509_v15 = vsub.f32 %v421_v47, %v499_v7 }
 0x21d   : > { %v960_v60 = vpop.eup %959  ;;  %v513_v16 = vmul.f32 1.442695, %v509_v15 }
 0x21e   : > { %v505_v61 = vpop.xlane.xlu2 %504  ;;  %v524_v62 = vsel %vm405_vm1, %v960_v60, 0.0 }
 0x21f   : > { %v511_v63 = vsub.f32 %v469_v50, %v505_v61  ;;  %525 = vadd.xlane.f32.xlu2 %v524_v62  ;;  %v901_v50 = vld [vmem:[%s1316_s3] sm:$0xff] }
 0x221   : > { %v517_v0 = vmul.f32 1.442695, %v511_v63 }
 0x223   : > { %961 = vpow2.f32 %v517_v0 }
 0x225   : > { %v614_v1 = vpop.permute.xlu0 %613 }
 0x226   : > { %v619_v2 = vsel %vm554_vm2, %v614_v1, 0  ;;  %v508_v3 = vpop.xlane.xlu2 %507 }
 0x227   : > { %v512_v4 = vsub.f32 %v493_v54, %v508_v3  ;;  %628 = vmatpush.bf16.msra.mxu3 %v619_v2 }
 0x229   : > { %v962_v5 = vpop.eup %961  ;;  %v519_v6 = vmul.f32 1.442695, %v512_v4 }
 0x22a   : > { %v527_v8 = vsel %vm405_vm1, %v962_v5, 0.0 }
 0x22b   : > { %963 = vpow2.f32 %v519_v6  ;;  %528 = vadd.xlane.f32.xlu2 %v527_v8 }
 0x22c   : > { %965 = vpow2.f32 %v513_v16 }
 0x22d   : > { %v550_v9 = vpop.permute.xlu0 %549 }
 0x22e   : > { %v556_v10 = vsel %vm554_vm2, %v550_v9, 0 }
 0x22f   : > { %565 = vmatpush.bf16.msra.mxu0 %v556_v10 }
 0x231   : > { %v964_v11 = vpop.eup %963 }
 0x232   : > { %v572_v12 = vpop.permute.xlu1 %571  ;;  %v530_v13 = vsel %vm405_vm1, %v964_v11, 0.0  ;;  %v966_v17 = vpop.eup %965 }
 0x233   : > { %v577_v14 = vsel %vm554_vm2, %v572_v12, 0  ;;  %531 = vadd.xlane.f32.xlu2 %v530_v13  ;;  %v521_v18 = vsel %vm405_vm1, %v966_v17, 0.0  ;;  %688 = vmatpush.bf16.msrb.mxu0 %v902_v49 }
 0x234   : > { %586 = vmatpush.bf16.msra.mxu1 %v577_v14 }
 0x237   : > { %689 = vmatpush.bf16.msrb.mxu0 %v901_v50 }
 0x24b   : > { %592 = vrot.lane.b32.xlu2 %v1205_v32, %s1072_s9  ;;  %s728_s9 = sshll.u32 %s1236_s12, 4  ;;  %s729_s9 = int_to_ptr.vmem [resolvable:$true] %s728_s9 }
 0x274   : > { %522 = vadd.xlane.f32.xlu2 %v521_v18 }
 0x292   : > { %v526_v19 = vpop.xlane.xlu2 %525 }
 0x293   : > { %967 = vrcp.f32 %v526_v19 }
 0x299   : > { %v968_v20 = vpop.eup %967 }
 0x29a   : > { %v538_v21 = vmul.f32 %v968_v20, %v960_v60 }
 0x29c   : > { %v546_v22 = vpack.c.bf16 %v538_v21, %v538_v21  ;;  %542 = vst.msk [vmem:[%s1236_s12 + $0x8] sm:$0xff] %vm405_vm1, %v538_v21 }
 0x29e   : > { %v529_v23 = vpop.xlane.xlu2 %528  ;;  %874 = vmatmul.msk.bf16.vlgmr.msra.gmra.mxu1 %vm405_vm1, %v546_v22 }
 0x29f   : > { %969 = vrcp.f32 %v529_v23 }
 0x2a5   : > { %v970_v24 = vpop.eup %969 }
 0x2a6   : > { %v539_v25 = vmul.f32 %v970_v24, %v962_v5  ;;  %v532_v26 = vpop.xlane.xlu2 %531 }
 0x2a7   : > { %971 = vrcp.f32 %v532_v26 }
 0x2a8   : > { %543 = vst.msk [vmem:[%s1236_s12 + $0x10] sm:$0xff] %vm405_vm1, %v539_v25  ;;  %v547_v32 = vpack.c.bf16 %v539_v25, %v539_v25 }
 0x2ad   : > { %v972_v27 = vpop.eup %971 }
 0x2ae   : > { %v540_v28 = vmul.f32 %v972_v27, %v964_v11  ;;  %v593_v29 = vpop.permute.xlu2 %592 }
 0x2af   : > { %v598_v30 = vsel %vm554_vm2, %v593_v29, 0 }
 0x2b0   : > { %v548_v31 = vpack.c.bf16 %v540_v28, %v540_v28  ;;  %607 = vmatpush.bf16.msra.mxu2 %v598_v30  ;;  %544 = vst.msk [vmem:[%s1236_s12 + $0x18] sm:$0xff] %vm405_vm1, %v540_v28 }
 0x2b2   : > { %876 = vmatmul.msk.bf16.vlgmr.msra.gmra.mxu3 %vm405_vm1, %v548_v31 }
 0x2b3   : > { %875 = vmatmul.msk.bf16.vlgmr.msra.gmra.mxu2 %vm405_vm1, %v547_v32 }
 0x2e7   : > { %v523_v33 = vpop.xlane.xlu2 %522 }
 0x2e8   : > { %973 = vrcp.f32 %v523_v33 }
 0x2ee   : > { %v974_v34 = vpop.eup %973 }
 0x2ef   : > { %v537_v35 = vmul.f32 %v974_v34, %v966_v17 }
 0x2f1   : > { %v545_v36 = vpack.c.bf16 %v537_v35, %v537_v35  ;;  %541 = vst.msk [vmem:[%s1236_s12] sm:$0xff] %vm405_vm1, %v537_v35 }
 0x2f3   : > { %873 = vmatmul.msk.bf16.vlgmr.msra.gmra.mxu0 %vm405_vm1, %v545_v36 }
 0x31b   : > { %v588_v37 = vpop.f32.mrf.mxu1 }
 0x31c   : > { %v637_v38 = vpack.c.bf16 %v588_v37, %v588_v37 }
 0x31e   : > { %639 = vrot.lane.b32.xlu1 %v637_v38, %s1320_s13 }
 0x323   : > { %v590_v39 = vpop.f32.mrf.mxu1 }
 0x335   : > { %v630_v40 = vpop.f32.mrf.mxu3 }
 0x336   : > { %v651_v41 = vpack.c.bf16 %v630_v40, %v630_v40  ;;  %v609_v42 = vpop.f32.mrf.mxu2 }
 0x337   : > { %v644_v43 = vpack.c.bf16 %v609_v42, %v609_v42 }
 0x338   : > { %653 = vrot.lane.b32.xlu1 %v651_v41, %s1074_s14  ;;  %s702_s14 = scalar_lea.sflag [#allocation6], %s1233_s10 }
 0x339   : > { %646 = vrot.lane.b32.xlu0 %v644_v43, %s1075_s15  ;;  %s989_s15 = sshra.s32 %s731_s11, 4  ;;  %s990_s15 = int_to_ptr.hbm [resolvable:$true] %s989_s15 }
 0x33a   : > { %s991_s16 = scalar_lea.hbm %s990_s15, 32  ;;  %p996_p0 = scmp.lt.s32.totalorder %s990_s15, %s1319_s6 }
 0x33b   : > { %p992_p11 = scmp.ne.s32.totalorder %s990_s15, %s991_s16  ;;  %p997_p1 = scmp.lt.s32.totalorder %s995_s19, %s991_s16 }
 0x33d   : > { %v632_v44 = vpop.f32.mrf.mxu3  ;;  %p993_p12 = pnand %p992_p11, %p1150_p5  ;;  %p998_p2 = por %p997_p1, %p996_p0 }
 0x33e   : > { %v611_v45 = vpop.f32.mrf.mxu2 }
 0x33f   : > { %p994_p13 = pneg %p993_p12 }
 0x341   : > { %p999_p3 = pnand %p998_p2, %p994_p13 }
 0x370   : > { %v567_v46 = vpop.f32.mrf.mxu0 }
 0x371   : > { %v634_v47 = vpack.c.bf16 %v567_v46, %v567_v46 }
 0x373   : > { %636 = vst.msk [vmem:[#allocation2] sm:$0xf] %vm635_vm3, %v634_v47 }
 0x378   : > { %v569_v48 = vpop.f32.mrf.mxu0 }
 0x390   : > { %v640_v51 = vpop.permute.xlu1 %639 }
 0x391   : > { %643 = vst.msk [vmem:[#allocation2] sm:$0xf] %vm642_vm4, %v640_v51 }
 0x3aa   : > { %v654_v53 = vpop.permute.xlu1 %653 }
 0x3ab   : > { %v647_v52 = vpop.permute.xlu0 %646 }
 0x3ac   : > { %650 = vst.msk [vmem:[#allocation2] sm:$0xf] %vm649_vm5, %v647_v52 }
 0x3ad   : > { %657 = vst.msk [vmem:[#allocation2] sm:$0xf] %vm656_vm6, %v654_v53 }
 0x3b4   : > { %v658_v54 = vld [vmem:[#allocation2] sm:$0xf] }
 0x3b5   : > { %885 = vmatmul.msk.bf16.vlgmr.msrb.gmra.mxu0 %vm304_vm0, %v658_v54 }
 0x3b6   : > { %1002 = shalt.err (!%p999_p3)
}
 0x3b7   : > { %s1076_s12 = smov 128   ;;  %s1325_s20 = smov 8   ;;  %v958_v55 = vld [vmem:[%s1317_s4] ss:$0 sm:$0xff] }
 0x3b8   : > { %905 = dma.vmem_to_hbm [thread:$0]  (%p1150_p5), %s729_s9, 512, %s731_s11, %s702_s14, %s1076_s12, %s1076_s12, %s1325_s20  }
 0x3b9   : > { %s888_s26 = sshll.u32 %s1133_s25, 3  ;;  %s830_s28 = sshll.u32 %s1233_s10, 3 }
 0x3ba   : > { %s712_s0 = scalar_lea.hbm %s1318_s5, %s888_s26  ;;  %s246_s16 = scalar_lea.vmem [#allocation3], %s830_s28 }
 0x3bb   : > { %s714_s18 = sshll.u32 %s246_s16, 4  ;;  %s716_s19 = sshll.u32 %s712_s0, 4  ;;  %s715_s18 = int_to_ptr.vmem [resolvable:$true] %s714_s18  ;;  %s717_s19 = int_to_ptr.hbm [resolvable:$true] %s716_s19 }
 0x3bc   : > { %s697_s25 = scalar_lea.sflag [#allocation4], %s1233_s10  ;;  %s1017_s9 = sshra.s32 %s717_s19, 4  ;;  %s1018_s9 = int_to_ptr.hbm [resolvable:$true] %s1017_s9 }
 0x3bd   : > { %s1019_s11 = scalar_lea.hbm %s1018_s9, 8  ;;  %s1023_s20 = scalar_lea.hbm %s1318_s5, 16 }
 0x3be   : > { %p1020_p4 = scmp.ne.s32.totalorder %s1018_s9, %s1019_s11  ;;  %p1024_p9 = scmp.lt.s32.totalorder %s1018_s9, %s1318_s5 }
 0x3bf   : > { %p1025_p10 = scmp.lt.s32.totalorder %s1023_s20, %s1019_s11 }
 0x3c0   : > { %p1021_p7 = pnand %p1020_p4, %p1150_p5 }
 0x3c1   : > { %p1026_p11 = por %p1025_p10, %p1024_p9 }
 0x3c2   : > { %p1022_p8 = pneg %p1021_p7 }
 0x3c4   : > { %p1027_p12 = pnand %p1026_p11, %p1022_p8 }
 0x432   : > { %v691_v56 = vpop.f32.mrf.mxu0 }
 0x433   : > { %v692_v57 = vadd.f32 %v958_v55, %v691_v56 }
 0x435   : > { %695 = vst.msk [vmem:[%s246_s16] sm:$0xff] %vm304_vm0, %v692_v57 }
 0x436   : > { %1030 = shalt.err (!%p1027_p12)
}
 0x437   : > { %904 = dma.vmem_to_hbm [thread:$0]  (%p1150_p5), %s715_s18, 128, %s717_s19, %s697_s25  }
 0x43a   : > { %v693_v58 = vpop.f32.mrf.mxu0 }
 0x43b PF: > { %p915_p13 = scmp.ge.s32.totalorder %s1069_s24, 2  ;;  %s745_s10 = sand.u32 1, %s1057_s21  }
 0x43c   : > { %s746_s29 = scalar_lea.sflag [#allocation4], %s745_s10 }
 0x43d   : > { %p909_p0 = pnand %p915_p13, %p1154_p6 }
 0x43f   : > { %p910_p1 = pneg %p909_p0 }
 0x441   : > { %1048 = dma.done.wait (%p910_p1), %s746_s29, 128  }
 0x442   : > { %1050 = vsyncadd (%p910_p1), %s746_s29, 4294967168  ;;  %s756_s17 = scalar_lea.sflag [#allocation6], %s745_s10 }
 0x443   : > { %1052 = dma.done.wait (%p910_p1), %s756_s17, 512  }
 0x444   : > { %1054 = vsyncadd (%p910_p1), %s756_s17, 4294966784  ;;  %p20_p5 = scmp.ge.s32.totalorder %s1137_s27, 4   ;;  %s1326_s21 = smov %s1061_s22 }
 0x445   : > { %s1327_s22 = smov %s1065_s23  ;;  %s1328_s23 = smov %s1148_s30 }
 0x446   : > { %s1329_s24 = smov %s1137_s27  ;;  %22 = sbr.rel (!%p20_p5) target bundleno = 7 (0x7), region = 92 }
 0x44b   :  { %762 = vsyncpa [#allocation4], 1 }
 0x44c   :  { %764 = vsyncpa [#allocation4 + $0x1], 1 }
 0x44d   :  { %765 = vsyncpa [#allocation6], 1 }
 0x44e   :  { %767 = vsyncpa [#allocation6 + $0x1], 1 }

</bundles_post_ra>
